<compile_context>
chip_gen: v5e
topology: v5e:2x2
jax: 0.10.0
libtpu: 0.0.40
codegen_flags: <defaults>
</compile_context>

<pallas_src>
import functools
import math

import jax
import jax.numpy as jnp
from jax import lax
from jax.experimental import pallas as pl
from jax.experimental.pallas import tpu as pltpu

# Problem sizes (small, consistent with the module's forward inputs).
B, S = 2, 12
QUERY_SIZE = 32   # input feature dim of `query`
KEY_SIZE = 32     # input feature dim of `key` / `value`; also sets scale_factor
HIDDEN = 32       # hidden_size of the three Linear layers
DROPOUT_P = 0.0   # dropout with p = 0.0 is the identity


def _attn_kernel(x_ref, w_ref, b_ref, out_ref, attn_ref, *,
                 batch, seq, inv_scale):
    # x_ref: (3, B*S, D) packed [query; key; value] activations.
    # w_ref: (3, D, H)   pre-transposed weights;  b_ref: (3, 1, H) biases.
    xq, xk, xv = x_ref[0], x_ref[1], x_ref[2]
    wq, wk, wv = w_ref[0], w_ref[1], w_ref[2]
    bq, bk, bv = b_ref[0], b_ref[1], b_ref[2]

    # Projections over the flattened (B*S, D) rows: 3 matmuls total, and each
    # bias broadcast is emitted exactly once (no per-batch unroll here).
    q = jnp.dot(xq, wq, preferred_element_type=jnp.float32) + bq
    k = jnp.dot(xk, wk, preferred_element_type=jnp.float32) + bk
    v = jnp.dot(xv, wv, preferred_element_type=jnp.float32) + bv

    outs, attns = [], []
    for b in range(batch):      # tiny static unroll: attention is per-batch
        rows = slice(b * seq, (b + 1) * seq)
        qb, kb, vb = q[rows], k[rows], v[rows]

        # qk = qb @ kb^T / sqrt(key_size); contract dim 1 of both (no k.T).
        qk = lax.dot_general(qb, kb, (((1,), (1,)), ((), ())),
                             preferred_element_type=jnp.float32) * inv_scale

        # Numerically-stable softmax; exact divide (attn is a returned output).
        m = jnp.max(qk, axis=-1, keepdims=True)
        e = jnp.exp(qk - m)
        attn = e / jnp.sum(e, axis=-1, keepdims=True)

        # Dropout with p = 0.0 is the identity.
        outs.append(jnp.dot(attn, vb, preferred_element_type=jnp.float32))
        attns.append(attn)

    # Single store per output: (B*S, H) and (B*S, S).
    out_ref[...] = jnp.concatenate(outs, axis=0).astype(out_ref.dtype)
    attn_ref[...] = jnp.concatenate(attns, axis=0).astype(attn_ref.dtype)


def prepare_params(wq, bq, wk, bk, wv, bv):
    """One-time weight-layout prep (call at init, NOT on every forward)."""
    w_all = jnp.stack([wq.T, wk.T, wv.T], axis=0)                 # (3, D, H)
    b_all = jnp.stack([bq.reshape(1, -1), bk.reshape(1, -1),
                       bv.reshape(1, -1)], axis=0)                # (3, 1, H)
    return w_all, b_all


@functools.partial(jax.jit, static_argnames=("key_size",))
def attention(query, key, value, w_all, b_all, *, key_size=KEY_SIZE):
    inv_scale = 1.0 / math.sqrt(float(key_size))   # compile-time Python float
    b, s, d = query.shape
    h = w_all.shape[-1]

    # Pack activations into one operand -> one DMA descriptor.
    x_all = jnp.stack([query, key, value], axis=0).reshape(3, b * s, d)

    kernel = functools.partial(_attn_kernel, batch=b, seq=s,
                               inv_scale=inv_scale)

    flops = 2 * (3 * (b * s) * d * h + 2 * b * s * s * h)
    bytes_accessed = 4 * (x_all.size + w_all.size + b_all.size
                          + b * s * h + b * s * s)
    cost = pl.CostEstimate(flops=flops, transcendentals=b * s * s,
                           bytes_accessed=bytes_accessed)

    vmem = pl.BlockSpec(memory_space=pltpu.MemorySpace.VMEM)
    out_flat, attn_flat = pl.pallas_call(
        kernel,
        out_shape=(jax.ShapeDtypeStruct((b * s, h), jnp.float32),   # output
                   jax.ShapeDtypeStruct((b * s, s), jnp.float32)),  # softmax_qk
        in_specs=[vmem, vmem, vmem],
        out_specs=(vmem, vmem),
        cost_estimate=cost,
    )(x_all, w_all, b_all)

    # Contiguous reshapes back to (B, S, .) -- layout plumbing, no copy.
    return out_flat.reshape(b, s, h), attn_flat.reshape(b, s, s)


def _init_linear(rng, out_features, in_features):
    # Deterministic nn.Linear-style init: U(-1/sqrt(fan_in), 1/sqrt(fan_in)).
    kw, kb = jax.random.split(rng)
    bound = 1.0 / math.sqrt(in_features)
    w = jax.random.uniform(kw, (out_features, in_features), jnp.float32,
                           -bound, bound)
    b = jax.random.uniform(kb, (1, out_features), jnp.float32, -bound, bound)
    return w, b


def _reference(query, key, value, wq, bq, wk, bk, wv, bv, key_size):
    q = query @ wq.T + bq
    k = key @ wk.T + bk
    v = value @ wv.T + bv
    qk = jnp.einsum("bqh,bkh->bqk", q, k) / math.sqrt(float(key_size))
    attn = jax.nn.softmax(qk, axis=-1)
    out = jnp.einsum("bqk,bkh->bqh", attn, v)
    return out, attn


if __name__ == "__main__":
    root = jax.random.PRNGKey(0)
    kq, kk, kv, kpq, kpk, kpv = jax.random.split(root, 6)

    query = jax.random.normal(kq, (B, S, QUERY_SIZE), jnp.float32)
    key = jax.random.normal(kk, (B, S, KEY_SIZE), jnp.float32)
    value = jax.random.normal(kv, (B, S, KEY_SIZE), jnp.float32)

    wq, bq = _init_linear(kpq, HIDDEN, QUERY_SIZE)
    wk, bk = _init_linear(kpk, HIDDEN, KEY_SIZE)
    wv, bv = _init_linear(kpv, HIDDEN, KEY_SIZE)

    # Hoisted parameter prep (once, outside the per-call path).
    w_all, b_all = prepare_params(wq, bq, wk, bk, wv, bv)

    out, softmax_qk = attention(query, key, value, w_all, b_all,
                                key_size=KEY_SIZE)
    out = jax.block_until_ready(out)
    softmax_qk = jax.block_until_ready(softmax_qk)

    ref_out, ref_attn = _reference(query, key, value, wq, bq, wk, bk, wv, bv,
                                   KEY_SIZE)
    assert out.shape == (B, S, HIDDEN) and softmax_qk.shape == (B, S, S)
    assert jnp.allclose(out, ref_out, atol=1e-3, rtol=1e-3)
    assert jnp.allclose(softmax_qk, ref_attn, atol=1e-3, rtol=1e-3)

    print("KERNEL_OK")
</pallas_src>

<mosaic_0001>
module attributes {stable_mosaic.version = 11 : i64} {
  func.func @_attn_kernel(%arg0: memref<3x24x32xf32, #tpu.memory_space<vmem>>, %arg1: memref<3x32x32xf32, #tpu.memory_space<vmem>>, %arg2: memref<3x1x32xf32, #tpu.memory_space<vmem>>, %arg3: memref<24x32xf32, #tpu.memory_space<vmem>>, %arg4: memref<24x12xf32, #tpu.memory_space<vmem>>) attributes {dimension_semantics = [], scalar_prefetch = 0 : i64, scratch_operands = 0 : i64, tpu.core_type = #tpu.core_type<tc>} {
    %c0 = arith.constant 0 : index
    %c0_0 = arith.constant 0 : index
    %c0_1 = arith.constant 0 : index
    %0 = vector.load %arg0[%c0, %c0_0, %c0_1] : memref<3x24x32xf32, #tpu.memory_space<vmem>>, vector<1x24x32xf32>
    %1 = vector.shape_cast %0 : vector<1x24x32xf32> to vector<24x32xf32>
    %c1 = arith.constant 1 : index
    %c0_2 = arith.constant 0 : index
    %c0_3 = arith.constant 0 : index
    %2 = vector.load %arg0[%c1, %c0_2, %c0_3] : memref<3x24x32xf32, #tpu.memory_space<vmem>>, vector<1x24x32xf32>
    %3 = vector.shape_cast %2 : vector<1x24x32xf32> to vector<24x32xf32>
    %c2 = arith.constant 2 : index
    %c0_4 = arith.constant 0 : index
    %c0_5 = arith.constant 0 : index
    %4 = vector.load %arg0[%c2, %c0_4, %c0_5] : memref<3x24x32xf32, #tpu.memory_space<vmem>>, vector<1x24x32xf32>
    %5 = vector.shape_cast %4 : vector<1x24x32xf32> to vector<24x32xf32>
    %c0_6 = arith.constant 0 : index
    %c0_7 = arith.constant 0 : index
    %c0_8 = arith.constant 0 : index
    %6 = vector.load %arg1[%c0_6, %c0_7, %c0_8] : memref<3x32x32xf32, #tpu.memory_space<vmem>>, vector<1x32x32xf32>
    %7 = vector.shape_cast %6 : vector<1x32x32xf32> to vector<32x32xf32>
    %c1_9 = arith.constant 1 : index
    %c0_10 = arith.constant 0 : index
    %c0_11 = arith.constant 0 : index
    %8 = vector.load %arg1[%c1_9, %c0_10, %c0_11] : memref<3x32x32xf32, #tpu.memory_space<vmem>>, vector<1x32x32xf32>
    %9 = vector.shape_cast %8 : vector<1x32x32xf32> to vector<32x32xf32>
    %c2_12 = arith.constant 2 : index
    %c0_13 = arith.constant 0 : index
    %c0_14 = arith.constant 0 : index
    %10 = vector.load %arg1[%c2_12, %c0_13, %c0_14] : memref<3x32x32xf32, #tpu.memory_space<vmem>>, vector<1x32x32xf32>
    %11 = vector.shape_cast %10 : vector<1x32x32xf32> to vector<32x32xf32>
    %c0_15 = arith.constant 0 : index
    %c0_16 = arith.constant 0 : index
    %c0_17 = arith.constant 0 : index
    %12 = vector.load %arg2[%c0_15, %c0_16, %c0_17] : memref<3x1x32xf32, #tpu.memory_space<vmem>>, vector<1x1x32xf32>
    %13 = vector.shape_cast %12 : vector<1x1x32xf32> to vector<1x32xf32>
    %c1_18 = arith.constant 1 : index
    %c0_19 = arith.constant 0 : index
    %c0_20 = arith.constant 0 : index
    %14 = vector.load %arg2[%c1_18, %c0_19, %c0_20] : memref<3x1x32xf32, #tpu.memory_space<vmem>>, vector<1x1x32xf32>
    %15 = vector.shape_cast %14 : vector<1x1x32xf32> to vector<1x32xf32>
    %c2_21 = arith.constant 2 : index
    %c0_22 = arith.constant 0 : index
    %c0_23 = arith.constant 0 : index
    %16 = vector.load %arg2[%c2_21, %c0_22, %c0_23] : memref<3x1x32xf32, #tpu.memory_space<vmem>>, vector<1x1x32xf32>
    %17 = vector.shape_cast %16 : vector<1x1x32xf32> to vector<1x32xf32>
    %cst = arith.constant dense<0.000000e+00> : vector<24x32xf32>
    %18 = tpu.matmul %1, %7, %cst {dimension_numbers = #tpu.dot_dimension_numbers<[1], [0], [0], [1], [0, 0, 1, 1], [], []>} : vector<24x32xf32>, vector<32x32xf32>, vector<24x32xf32> -> vector<24x32xf32>
    %19 = vector.broadcast %13 : vector<1x32xf32> to vector<24x32xf32>
    %20 = arith.addf %18, %19 : vector<24x32xf32>
    %cst_24 = arith.constant dense<0.000000e+00> : vector<24x32xf32>
    %21 = tpu.matmul %3, %9, %cst_24 {dimension_numbers = #tpu.dot_dimension_numbers<[1], [0], [0], [1], [0, 0, 1, 1], [], []>} : vector<24x32xf32>, vector<32x32xf32>, vector<24x32xf32> -> vector<24x32xf32>
    %22 = vector.broadcast %15 : vector<1x32xf32> to vector<24x32xf32>
    %23 = arith.addf %21, %22 : vector<24x32xf32>
    %cst_25 = arith.constant dense<0.000000e+00> : vector<24x32xf32>
    %24 = tpu.matmul %5, %11, %cst_25 {dimension_numbers = #tpu.dot_dimension_numbers<[1], [0], [0], [1], [0, 0, 1, 1], [], []>} : vector<24x32xf32>, vector<32x32xf32>, vector<24x32xf32> -> vector<24x32xf32>
    %25 = vector.broadcast %17 : vector<1x32xf32> to vector<24x32xf32>
    %26 = arith.addf %24, %25 : vector<24x32xf32>
    %27 = vector.extract_strided_slice %20 {offsets = [0, 0], sizes = [12, 32], strides = [1, 1]} : vector<24x32xf32> to vector<12x32xf32>
    %28 = vector.extract_strided_slice %23 {offsets = [0, 0], sizes = [12, 32], strides = [1, 1]} : vector<24x32xf32> to vector<12x32xf32>
    %29 = vector.extract_strided_slice %26 {offsets = [0, 0], sizes = [12, 32], strides = [1, 1]} : vector<24x32xf32> to vector<12x32xf32>
    %cst_26 = arith.constant dense<0.000000e+00> : vector<12x12xf32>
    %30 = tpu.matmul %27, %28, %cst_26 {dimension_numbers = #tpu.dot_dimension_numbers<[1], [1], [0], [0], [0, 0, 1, 0], [], []>} : vector<12x32xf32>, vector<12x32xf32>, vector<12x12xf32> -> vector<12x12xf32>
    %cst_27 = arith.constant 0.176776692 : f32
    %31 = vector.broadcast %cst_27 : f32 to vector<12x12xf32>
    %32 = arith.mulf %30, %31 : vector<12x12xf32>
    %cst_28 = arith.constant dense<0xFF800000> : vector<12xf32>
    %33 = vector.multi_reduction <maximumf>, %32, %cst_28 [1] : vector<12x12xf32> to vector<12xf32>
    %34 = vector.shape_cast %33 : vector<12xf32> to vector<12x1xf32>
    %35 = vector.broadcast %34 : vector<12x1xf32> to vector<12x12xf32>
    %36 = arith.subf %32, %35 : vector<12x12xf32>
    %37 = math.exp %36 : vector<12x12xf32>
    %cst_29 = arith.constant dense<0.000000e+00> : vector<12xf32>
    %38 = vector.multi_reduction <add>, %37, %cst_29 [1] : vector<12x12xf32> to vector<12xf32>
    %39 = vector.shape_cast %38 : vector<12xf32> to vector<12x1xf32>
    %40 = vector.broadcast %39 : vector<12x1xf32> to vector<12x12xf32>
    %41 = arith.divf %37, %40 : vector<12x12xf32>
    %cst_30 = arith.constant dense<0.000000e+00> : vector<12x32xf32>
    %42 = tpu.matmul %41, %29, %cst_30 {dimension_numbers = #tpu.dot_dimension_numbers<[1], [0], [0], [1], [0, 0, 1, 1], [], []>} : vector<12x12xf32>, vector<12x32xf32>, vector<12x32xf32> -> vector<12x32xf32>
    %43 = vector.extract_strided_slice %20 {offsets = [12, 0], sizes = [12, 32], strides = [1, 1]} : vector<24x32xf32> to vector<12x32xf32>
    %44 = vector.extract_strided_slice %23 {offsets = [12, 0], sizes = [12, 32], strides = [1, 1]} : vector<24x32xf32> to vector<12x32xf32>
    %45 = vector.extract_strided_slice %26 {offsets = [12, 0], sizes = [12, 32], strides = [1, 1]} : vector<24x32xf32> to vector<12x32xf32>
    %cst_31 = arith.constant dense<0.000000e+00> : vector<12x12xf32>
    %46 = tpu.matmul %43, %44, %cst_31 {dimension_numbers = #tpu.dot_dimension_numbers<[1], [1], [0], [0], [0, 0, 1, 0], [], []>} : vector<12x32xf32>, vector<12x32xf32>, vector<12x12xf32> -> vector<12x12xf32>
    %cst_32 = arith.constant 0.176776692 : f32
    %47 = vector.broadcast %cst_32 : f32 to vector<12x12xf32>
    %48 = arith.mulf %46, %47 : vector<12x12xf32>
    %cst_33 = arith.constant dense<0xFF800000> : vector<12xf32>
    %49 = vector.multi_reduction <maximumf>, %48, %cst_33 [1] : vector<12x12xf32> to vector<12xf32>
    %50 = vector.shape_cast %49 : vector<12xf32> to vector<12x1xf32>
    %51 = vector.broadcast %50 : vector<12x1xf32> to vector<12x12xf32>
    %52 = arith.subf %48, %51 : vector<12x12xf32>
    %53 = math.exp %52 : vector<12x12xf32>
    %cst_34 = arith.constant dense<0.000000e+00> : vector<12xf32>
    %54 = vector.multi_reduction <add>, %53, %cst_34 [1] : vector<12x12xf32> to vector<12xf32>
    %55 = vector.shape_cast %54 : vector<12xf32> to vector<12x1xf32>
    %56 = vector.broadcast %55 : vector<12x1xf32> to vector<12x12xf32>
    %57 = arith.divf %53, %56 : vector<12x12xf32>
    %cst_35 = arith.constant dense<0.000000e+00> : vector<12x32xf32>
    %58 = tpu.matmul %57, %45, %cst_35 {dimension_numbers = #tpu.dot_dimension_numbers<[1], [0], [0], [1], [0, 0, 1, 1], [], []>} : vector<12x12xf32>, vector<12x32xf32>, vector<12x32xf32> -> vector<12x32xf32>
    %59 = tpu.concatenate %42, %58 in 0 : vector<12x32xf32>, vector<12x32xf32> -> vector<24x32xf32>
    %c0_36 = arith.constant 0 : index
    %c0_37 = arith.constant 0 : index
    %60 = vector.load %arg3[%c0_36, %c0_37] : memref<24x32xf32, #tpu.memory_space<vmem>>, vector<24x32xf32>
    tpu.vector_store %arg3[%c0_36, %c0_37], %59 {strides = array<i32>} : memref<24x32xf32, #tpu.memory_space<vmem>>, vector<24x32xf32>,
    %61 = tpu.concatenate %41, %57 in 0 : vector<12x12xf32>, vector<12x12xf32> -> vector<24x12xf32>
    %c0_38 = arith.constant 0 : index
    %c0_39 = arith.constant 0 : index
    %62 = vector.load %arg4[%c0_38, %c0_39] : memref<24x12xf32, #tpu.memory_space<vmem>>, vector<24x12xf32>
    tpu.vector_store %arg4[%c0_38, %c0_39], %61 {strides = array<i32>} : memref<24x12xf32, #tpu.memory_space<vmem>>, vector<24x12xf32>,
    return
  }
}

</mosaic_0001>

<bundles_post_ra>
// kernel: attention.1
= control target key start
LH: loop header
LB: loop body
LE: loop exit
PB: predicated region body
PF: predicated region fallthrough
CT: control target
= control target key end

     0   :  { %vm49_vm0 = vcmask 261120   ;;  %vm254_vm1 = vcmask 1043456   ;;  %vm198_vm2 = vcmask 97280   ;;  %vm202_vm3 = vcmask 93184   ;;  %s667_s1 = inlined_call_operand.vmem [shape: f32[3,32,32], index: 1, kind: input, shape index: {}]   ;;  %s668_s0 = inlined_call_operand.vmem [shape: f32[3,24,32], index: 0, kind: input, shape index: {}]   ;;  %s669_s2 = inlined_call_operand.vmem [shape: f32[3,1,32], index: 2, kind: input, shape index: {}]   ;;  %s670_s4 = inlined_call_operand.vmem [shape: f32[24,12], index: 4, kind: output, shape index: {1}]   ;;  %s671_s3 = inlined_call_operand.vmem [shape: f32[24,32], index: 3, kind: output, shape index: {0}]  }
   0x1   :  { %v443_v0 = vld [vmem:[%s667_s1 + $0x38] sm:$0xff]  ;;  %v442_v1 = vld [vmem:[%s667_s1 + $0x30] sm:$0xff]  ;;  %v441_v3 = vld [vmem:[%s667_s1 + $0x28] sm:$0xff] }
   0x2   :  { %109 = vmatpush.msra.mxu1 %v443_v0  ;;  %v30_v2 = vld [vmem:[%s667_s1 + $0x18] sm:$0xff]  ;;  %v29_v4 = vld [vmem:[%s667_s1 + $0x10] sm:$0xff]  ;;  %v28_v5 = vld [vmem:[%s667_s1 + $0x8] sm:$0xff] }
   0x3   :  { %71 = vmatpush.msra.mxu0 %v30_v2  ;;  %v440_v6 = vld [vmem:[%s667_s1 + $0x20] sm:$0xff]  ;;  %v434_v7 = vld [vmem:[%s668_s0 + $0x18] sm:$0xff]  ;;  %v17_v11 = vld [vmem:[%s668_s0 + $0x8] sm:$0xff] }
   0x4   :  { %110 = vmatpush.msra.mxu1 %v442_v1  ;;  %v27_v8 = vld [vmem:[%s667_s1] sm:$0xff]  ;;  %v436_v12 = vld [vmem:[%s668_s0 + $0x28] sm:$0xff]  ;;  %v18_v13 = vld [vmem:[%s668_s0 + $0x10] sm:$0xff] }
   0x5   :  { %72 = vmatpush.msra.mxu0 %v29_v4  ;;  %v16_v9 = vld [vmem:[%s668_s0] sm:$0xff]  ;;  %v447_v14 = vld [vmem:[%s667_s1 + $0x58] sm:$0xff]  ;;  %v446_v15 = vld [vmem:[%s667_s1 + $0x50] sm:$0xff] }
   0x6   :  { %111 = vmatpush.msra.mxu1 %v441_v3  ;;  %v435_v10 = vld [vmem:[%s668_s0 + $0x20] sm:$0xff]  ;;  %147 = vmatpush.msra.mxu2 %v447_v14  ;;  %v445_v16 = vld [vmem:[%s667_s1 + $0x48] sm:$0xff]  ;;  %v437_v18 = vld [vmem:[%s668_s0 + $0x30] sm:$0xff] }
   0x7   :  { %73 = vmatpush.msra.mxu0 %v28_v5  ;;  %v444_v17 = vld [vmem:[%s667_s1 + $0x40] sm:$0xff]  ;;  %v438_v19 = vld [vmem:[%s668_s0 + $0x38] sm:$0xff] }
   0x8   :  { %112 = vmatpush.msra.mxu1 %v440_v6  ;;  %148 = vmatpush.msra.mxu2 %v446_v15  ;;  %v439_v20 = vld [vmem:[%s668_s0 + $0x40] sm:$0xff] }
   0x9   :  { %453 = vmatmul.msk.f32.vlgmr.msra.gmra.mxu1 %vm49_vm0, %v434_v7  ;;  %74 = vmatpush.msra.mxu0 %v27_v8  ;;  %v475_v23 = vld [vmem:[%s669_s2 + $0x1] ss:$0 sm:$0xff]  ;;  %v476_v27 = vld [vmem:[%s669_s2] ss:$0 sm:$0xff]  ;;  %v477_v42 = vld [vmem:[%s669_s2 + $0x2] ss:$0 sm:$0xff] }
   0xa   :  { %450 = vmatmul.msk.f32.vlgmr.msra.gmra.mxu0 %vm49_vm0, %v16_v9  ;;  %149 = vmatpush.msra.mxu2 %v445_v16 }
   0xc   :  { %150 = vmatpush.msra.mxu2 %v444_v17 }
   0xd   :  { %456 = vmatmul.msk.f32.vlgmr.msra.gmra.mxu2 %vm49_vm0, %v437_v18 }
  0x11   :  { %454 = vmatmul.msk.f32.gmra.mxu1 %vm49_vm0, %v435_v10 }
  0x12   :  { %451 = vmatmul.msk.f32.gmra.mxu0 %vm49_vm0, %v17_v11 }
  0x15   :  { %457 = vmatmul.msk.f32.gmra.mxu2 %vm49_vm0, %v438_v19 }
  0x19   :  { %455 = vmatmul.msk.f32.gmra.mxu1 %vm49_vm0, %v436_v12 }
  0x1a   :  { %452 = vmatmul.msk.f32.gmra.mxu0 %vm49_vm0, %v18_v13 }
  0x1d   :  { %458 = vmatmul.msk.f32.gmra.mxu2 %vm49_vm0, %v439_v20 }
  0x86   :  { %v114_v21 = vpop.f32.mrf.mxu1 }
  0x87   :  { %v76_v22 = vpop.f32.mrf.mxu0  ;;  %v115_v28 = vadd.f32 %v475_v23, %v114_v21 }
  0x88   :  { %v77_v29 = vadd.f32 %v476_v27, %v76_v22 }
  0x8e   :  { %v117_v24 = vpop.f32.mrf.mxu1 }
  0x8f   :  { %v118_v25 = vadd.f32 %v475_v23, %v117_v24  ;;  %v79_v26 = vpop.f32.mrf.mxu0 }
  0x90   :  { %v80_v34 = vadd.f32 %v476_v27, %v79_v26  ;;  %v152_v41 = vpop.f32.mrf.mxu2 }
  0x91   :  { %459 = vmatpush.xpose.msk.msra.mxu3 %vm49_vm0, %v118_v25  ;;  %v286_v36 = vrot.slane %v118_v25, 4  ;;  %v153_v44 = vadd.f32 %v477_v42, %v152_v41 }
  0x92   :  { %v282_v37 = vrot.slane %v80_v34, 4 }
  0x95   :  { %460 = vmatpush.xpose.msk.msra.mxu3 %vm49_vm0, %v115_v28 }
  0x96   :  { %v120_v30 = vpop.f32.mrf.mxu1 }
  0x97   :  { %v121_v31 = vadd.f32 %v475_v23, %v120_v30  ;;  %v82_v32 = vpop.f32.mrf.mxu0 }
  0x98   :  { %461 = vmatmul.msk.f32.vlgmr.msra.gmra.mxu3 %vm49_vm0, %v77_v29  ;;  %v83_v35 = vadd.f32 %v476_v27, %v82_v32  ;;  %v155_v43 = vpop.f32.mrf.mxu2 }
  0x99   :  { %v287_v33 = vrot.slane %v121_v31, 4  ;;  %v156_v45 = vadd.f32 %v477_v42, %v155_v43 }
  0x9a   :  { %v283_v38 = vrot.slane %v83_v35, 4 }
  0x9b   :  { %466 = vmatpush.xpose.msk.msrb.mxu0 %vm49_vm0, %v287_v33  ;;  %473 = vmatpush.xpose.msk.msrb.mxu2 %vm49_vm0, %v287_v33  ;;  %v288_v39 = vsel %vm254_vm1, %v286_v36, %v287_v33  ;;  %v371_v48 = vrot.slane %v156_v45, 4 }
  0x9c   :  { %v284_v40 = vsel %vm254_vm1, %v282_v37, %v283_v38  ;;  %463 = vmatpush.msk.msrb.mxu3 %vm254_vm1, %v156_v45 }
  0x9e   :  { %273 = vmatpush.msrb.mxu3 %v153_v44 }
  0x9f   :  { %467 = vmatpush.xpose.msk.msrb.mxu0 %vm49_vm0, %v288_v39  ;;  %474 = vmatpush.xpose.msk.msrb.mxu2 %vm49_vm0, %v288_v39 }
  0xa0   :  { %462 = vmatmul.msk.f32.gmra.mxu3 %vm49_vm0, %v80_v34  ;;  %v158_v46 = vpop.f32.mrf.mxu2 }
  0xa1   :  { %v159_v47 = vadd.f32 %v477_v42, %v158_v46 }
  0xa2   :  { %468 = vmatmul.msk.f32.vlgmr.msrb.gmra.mxu0 %vm49_vm0, %v284_v40  ;;  %469 = vmatmul.msk.f32.vlgmr.msrb.gmra.mxu2 %vm49_vm0, %v283_v38 }
  0xa3   :  { %v372_v49 = vrot.slane %v159_v47, 4 }
  0xa5   :  { %470 = vmatpush.msk.msrb.mxu1 %vm254_vm1, %v372_v49  ;;  %v373_v50 = vsel %vm254_vm1, %v371_v48, %v372_v49 }
  0xa7   :  { %398 = vmatpush.msrb.mxu1 %v373_v50 }
 0x11b   :  { %v190_v51 = vpop.f32.mrf.mxu3 }
 0x11c   :  { %v196_v52 = vmul.f32 0.17677669, %v190_v51 }
 0x11e   :  { %v199_v53 = vsel %vm198_vm2, %v196_v52, -inf }
 0x11f   :  { %200 = vmax.xlane.f32.xlu0 %v199_v53  ;;  %v314_v54 = vpop.f32.mrf.mxu0 }
 0x120   :  { %v320_v55 = vmul.f32 0.17677669, %v314_v54 }
 0x122   :  { %v322_v58 = vsel %vm198_vm2, %v320_v55, -inf }
 0x123   :  { %v193_v56 = vpop.f32.mrf.mxu3 }
 0x124   :  { %v197_v57 = vmul.f32 0.17677669, %v193_v56 }
 0x125   :  { %v317_v60 = vpop.f32.mrf.mxu2 }
 0x126   :  { %v203_v59 = vsel %vm202_vm3, %v197_v57, -inf  ;;  %v321_v61 = vmul.f32 0.17677669, %v317_v60 }
 0x127   :  { %323 = vmax.xlane.f32.xlu0 %v322_v58  ;;  %204 = vmax.xlane.f32.xlu1 %v203_v59 }
 0x128   :  { %v325_v62 = vsel %vm202_vm3, %v321_v61, -inf }
 0x12f   :  { %326 = vmax.xlane.f32.xlu1 %v325_v62 }
 0x192   :  { %v201_v63 = vpop.xlane.xlu0 %200 }
 0x193   :  { %v206_v0 = vsub.f32 %v196_v52, %v201_v63 }
 0x195   :  { %v208_v1 = vmul.f32 1.442695, %v206_v0 }
 0x197   :  { %478 = vpow2.f32 %v208_v1 }
 0x19a   :  { %v324_v2 = vpop.xlane.xlu0 %323  ;;  %v205_v3 = vpop.xlane.xlu1 %204 }
 0x19b   :  { %v328_v4 = vsub.f32 %v320_v55, %v324_v2  ;;  %v207_v5 = vsub.f32 %v197_v57, %v205_v3 }
 0x19d   :  { %v479_v6 = vpop.eup %478  ;;  %v330_v7 = vmul.f32 1.442695, %v328_v4  ;;  %v210_v8 = vmul.f32 1.442695, %v207_v5 }
 0x19e   :  { %v212_v9 = vsel %vm198_vm2, %v479_v6, 0.0 }
 0x19f   :  { %480 = vpow2.f32 %v330_v7  ;;  %213 = vadd.xlane.f32.xlu2 %v212_v9 }
 0x1a0   :  { %482 = vpow2.f32 %v210_v8 }
 0x1a2   :  { %v327_v10 = vpop.xlane.xlu1 %326 }
 0x1a3   :  { %v329_v11 = vsub.f32 %v321_v61, %v327_v10 }
 0x1a5   :  { %v620_v12 = vpop.eup %480  ;;  %v332_v13 = vmul.f32 1.442695, %v329_v11 }
 0x1a6   :  { %v622_v14 = vpop.eup %482  ;;  %v334_v15 = vsel %vm198_vm2, %v620_v12, 0.0 }
 0x1a7   :  { %484 = vpow2.f32 %v332_v13  ;;  %335 = vadd.xlane.f32.xlu2 %v334_v15  ;;  %v215_v16 = vsel %vm202_vm3, %v622_v14, 0.0 }
 0x1a8   :  { %216 = vadd.xlane.f32.xlu0 %v215_v16 }
 0x1ad   :  { %v628_v17 = vpop.eup %484 }
 0x1ae   :  { %v337_v18 = vsel %vm202_vm3, %v628_v17, 0.0 }
 0x1af   :  { %338 = vadd.xlane.f32.xlu1 %v337_v18 }
 0x212   :  { %v214_v19 = vpop.xlane.xlu2 %213 }
 0x213   :  { %486 = vrcp.f32 %v214_v19  ;;  %v229_v26 = vand.u32 2147483648, %v214_v19  ;;  %v227_v27 = vand.u32 2147483647, %v214_v19  ;;  %vm223_vm5 = vweird.f32 %v214_v19 }
 0x215   :  { %v230_v31 = vor.u32 1.1754944e-38, %v229_v26  ;;  %vm228_vm7 = vcmp.eq.f32.partialorder %v227_v27, 8.507059e+37 }
 0x219   :  { %v487_v20 = vpop.eup %486 }
 0x21a   :  { %v219_v21 = vmul.f32 %v487_v20, %v214_v19  ;;  %v336_v22 = vpop.xlane.xlu2 %335  ;;  %vm224_vm4 = vweird.f32 %v487_v20 }
 0x21b   :  { %488 = vrcp.f32 %v336_v22  ;;  %v217_v23 = vpop.xlane.xlu0 %216  ;;  %vm225_vm6 = vmor %vm223_vm5, %vm224_vm4  ;;  %v351_v38 = vand.u32 2147483648, %v336_v22  ;;  %v349_v42 = vand.u32 2147483647, %v336_v22  ;;  %vm345_vm10 = vweird.f32 %v336_v22 }
 0x21c   :  { %v220_v24 = vsub.f32 1.0, %v219_v21  ;;  %490 = vrcp.f32 %v217_v23  ;;  %v244_v43 = vand.u32 2147483648, %v217_v23  ;;  %v242_v45 = vand.u32 2147483647, %v217_v23 }
 0x21d   :  { %v352_v48 = vor.u32 1.1754944e-38, %v351_v38  ;;  %vm238_vm12 = vweird.f32 %v217_v23  ;;  %vm350_vm13 = vcmp.eq.f32.partialorder %v349_v42, 8.507059e+37 }
 0x21e   :  { %v221_v25 = vmul.f32 %v487_v20, %v220_v24  ;;  %v245_v51 = vor.u32 1.1754944e-38, %v244_v43  ;;  %vm243_vm15 = vcmp.eq.f32.partialorder %v242_v45, 8.507059e+37 }
 0x220   :  { %v222_v28 = vadd.f32 %v487_v20, %v221_v25 }
 0x221   :  { %v489_v29 = vpop.eup %488 }
 0x222   :  { %v491_v30 = vpop.eup %490  ;;  %v341_v32 = vmul.f32 %v489_v29, %v336_v22  ;;  %v339_v33 = vpop.xlane.xlu1 %338  ;;  %v226_v34 = vsel %vm225_vm6, %v487_v20, %v222_v28  ;;  %vm346_vm8 = vweird.f32 %v489_v29 }
 0x223   :  { %v234_v35 = vmul.f32 %v491_v30, %v217_v23  ;;  %492 = vrcp.f32 %v339_v33  ;;  %v231_v37 = vsel %vm228_vm7, %v230_v31, %v226_v34  ;;  %vm239_vm9 = vweird.f32 %v491_v30  ;;  %vm347_vm11 = vmor %vm345_vm10, %vm346_vm8 }
 0x224   :  { %v342_v36 = vsub.f32 1.0, %v341_v32  ;;  %v232_v40 = vmul.f32 %v479_v6, %v231_v37  ;;  %vm240_vm14 = vmor %vm238_vm12, %vm239_vm9  ;;  %v366_v58 = vand.u32 2147483648, %v339_v33  ;;  %v364_v61 = vand.u32 2147483647, %v339_v33 }
 0x225   :  { %v235_v39 = vsub.f32 1.0, %v234_v35  ;;  %vm360_vm4 = vweird.f32 %v339_v33 }
 0x226   :  { %v343_v41 = vmul.f32 %v489_v29, %v342_v36  ;;  %464 = vmatmul.msk.f32.vlgmr.msrb.gmra.mxu3 %vm198_vm2, %v232_v40  ;;  %423 = vst.msk [vmem:[%s670_s4] sm:$0xff] %vm198_vm2, %v232_v40  ;;  %v367_v1 = vor.u32 1.1754944e-38, %v366_v58  ;;  %vm365_vm6 = vcmp.eq.f32.partialorder %v364_v61, 8.507059e+37 }
 0x227   :  { %v236_v44 = vmul.f32 %v491_v30, %v235_v39 }
 0x228   :  { %v344_v46 = vadd.f32 %v489_v29, %v343_v41 }
 0x229   :  { %v493_v47 = vpop.eup %492  ;;  %v237_v49 = vadd.f32 %v491_v30, %v236_v44 }
 0x22a   :  { %v348_v50 = vsel %vm347_vm11, %v489_v29, %v344_v46  ;;  %v356_v52 = vmul.f32 %v493_v47, %v339_v33  ;;  %vm361_vm3 = vweird.f32 %v493_v47 }
 0x22b   :  { %v241_v53 = vsel %vm240_vm14, %v491_v30, %v237_v49  ;;  %v353_v54 = vsel %vm350_vm13, %v352_v48, %v348_v50  ;;  %vm362_vm5 = vmor %vm360_vm4, %vm361_vm3 }
 0x22c   :  { %v357_v55 = vsub.f32 1.0, %v356_v52  ;;  %v246_v56 = vsel %vm243_vm15, %v245_v51, %v241_v53  ;;  %v354_v57 = vmul.f32 %v620_v12, %v353_v54 }
 0x22d   :  { %v247_v59 = vmul.f32 %v622_v14, %v246_v56 }
 0x22e   :  { %v358_v60 = vmul.f32 %v493_v47, %v357_v55  ;;  %471 = vmatmul.msk.f32.vlgmr.msrb.gmra.mxu1 %vm198_vm2, %v354_v57  ;;  %v417_v62 = vrot.slane %v354_v57, 4 }
 0x22f   :  { %465 = vmatmul.msk.f32.gmra.mxu3 %vm198_vm2, %v247_v59 }
 0x230   :  { %v359_v63 = vadd.f32 %v493_v47, %v358_v60  ;;  %v422_v0 = vsel %vm254_vm1, %v247_v59, %v417_v62 }
 0x231   :  { %424 = vst.msk [vmem:[%s670_s4 + $0x8] sm:$0xff] %vm198_vm2, %v422_v0 }
 0x232   :  { %v363_v2 = vsel %vm362_vm5, %v493_v47, %v359_v63 }
 0x233   :  { %v368_v3 = vsel %vm365_vm6, %v367_v1, %v363_v2 }
 0x234   :  { %v369_v4 = vmul.f32 %v628_v17, %v368_v3 }
 0x236   :  { %472 = vmatmul.msk.f32.gmra.mxu1 %vm198_vm2, %v369_v4  ;;  %v418_v5 = vrot.slane %v369_v4, 4 }
 0x238   :  { %v419_v6 = vsel %vm254_vm1, %v417_v62, %v418_v5 }
 0x239   :  { %425 = vst.msk [vmem:[%s670_s4 + $0x10] sm:$0xff] %vm198_vm2, %v419_v6 }
 0x2a9   :  { %v275_v7 = vpop.f32.mrf.mxu3 }
 0x2aa   :  { %414 = vst.msk [vmem:[%s671_s3] sm:$0xff] %vm49_vm0, %v275_v7 }
 0x2ab   :  { %v400_v8 = vpop.f32.mrf.mxu1 }
 0x2ac   :  { %v408_v9 = vrot.slane %v400_v8, 4 }
 0x2b2   :  { %v278_v10 = vpop.f32.mrf.mxu3 }
 0x2b3   :  { %v413_v11 = vsel %vm254_vm1, %v278_v10, %v408_v9  ;;  %v403_v12 = vpop.f32.mrf.mxu1 }
 0x2b4   :  { %415 = vst.msk [vmem:[%s671_s3 + $0x8] sm:$0xff] %vm49_vm0, %v413_v11  ;;  %v409_v13 = vrot.slane %v403_v12, 4 }
 0x2b6   :  { %v410_v14 = vsel %vm254_vm1, %v408_v9, %v409_v13 }
 0x2b7   :  { %416 = vst.msk [vmem:[%s671_s3 + $0x10] sm:$0xff] %vm49_vm0, %v410_v14 }

</bundles_post_ra>
